<compile_context>
chip_gen: v5e
topology: v5e:2x2
jax: 0.10.0
libtpu: 0.0.40
codegen_flags: <defaults>
</compile_context>

<pallas_src>
import functools
import math

import jax
import jax.numpy as jnp
from jax.experimental import pallas as pl
from jax.experimental.pallas import tpu as pltpu

AZ_MIN_DEFAULT = -math.pi / 2.0
AZ_MAX_DEFAULT = math.pi / 2.0
ELE_MIN_DEFAULT = 0.0
ELE_MAX_DEFAULT = 2.0 * math.pi / 9.0

# Row order of the lane-major (8, bn) kernel output (the 8 distinct non-zero
# entries of R = R_az @ R_ele @ R_0; the 4 remaining entries of the (3, 4)
# output are structural zeros added in the wrapper):
#   0: sa*ce   1: ca   2: sa*se   3: -ca*ce   4: sa   5: -ca*se   6: -se   7: ce


def _rotmat_kernel(ang_ref, out_ref, *, az_min, az_max, ele_min, ele_max):
    # ang_ref: (2, TB) f32, batch on lanes; clamp bounds baked in as Python
    # floats (no SMEM reads, no broadcast inputs).
    az = jnp.clip(ang_ref[0:1, :], az_min, az_max)    # (1, TB)
    ele = jnp.clip(ang_ref[1:2, :], ele_min, ele_max)  # (1, TB)

    # Exactly 4 transcendentals per batch element, all f32.
    sa = jnp.sin(az)
    ca = jnp.cos(az)
    se = jnp.sin(ele)
    ce = jnp.cos(ele)

    # Assemble the 8 distinct non-zero entries as one (8, TB) value and store
    # it with a single full-block (unmasked) write: 8 sublanes == one (8,128)
    # f32 tile, so there is no sublane padding and no masked vst.
    rows = jnp.concatenate(
        [sa * ce, ca, sa * se, -(ca * ce), sa, -(ca * se), -se, ce], axis=0)
    out_ref[...] = rows.astype(out_ref.dtype)


def _round_up(x, m):
    return ((x + m - 1) // m) * m


def _fused_small(angles, az_min, az_max, ele_min, ele_max, out_dtype):
    """Fused closed-form jnp path for small batches (no Pallas launch)."""
    az = jnp.clip(angles[:, 0].astype(jnp.float32), az_min, az_max)
    ele = jnp.clip(angles[:, 1].astype(jnp.float32), ele_min, ele_max)
    sa, ca = jnp.sin(az), jnp.cos(az)
    se, ce = jnp.sin(ele), jnp.cos(ele)
    z = jnp.zeros_like(sa)
    out12 = jnp.stack(
        [sa * ce, ca, sa * se, z,
         -(ca * ce), sa, -(ca * se), z,
         -se, z, ce, z], axis=-1)
    return out12.reshape(angles.shape[0], 3, 4).astype(out_dtype)


def get_rotation_matrix(angles,
                        az_min=AZ_MIN_DEFAULT, az_max=AZ_MAX_DEFAULT,
                        ele_min=ELE_MIN_DEFAULT, ele_max=ELE_MAX_DEFAULT,
                        *,
                        block_b=32768,
                        out_dtype=None,
                        min_pallas_batch=16384,
                        return_lane_major=False):
    """angles: (bn, 2) -> (bn, 3, 4) rotation matrices (zero 4th column).

    If return_lane_major=True, returns the raw lane-dense (8, bn) slab
    (row order documented above) and skips the wrapper-side transpose — use
    this when the consumer can read the slab directly (largest end-to-end
    HBM saving, since the transpose re-reads/re-writes the whole result).
    """
    assert angles.ndim == 2 and angles.shape[1] == 2
    bn = angles.shape[0]
    out_dtype = angles.dtype if out_dtype is None else out_dtype
    az_min, az_max = float(az_min), float(az_max)
    ele_min, ele_max = float(ele_min), float(ele_max)

    # Small-batch fast path: a single fused XLA elementwise op beats the
    # pallas_call fixed cost + wrapper transposes below ~16K elements.
    if (not return_lane_major) and bn < min_pallas_batch:
        return _fused_small(angles, az_min, az_max, ele_min, ele_max, out_dtype)

    # Lane tiling: multiples of 128, biggest tile that fits comfortably in
    # VMEM (out block (8, 32768) f32 ~ 1 MiB), but split into >= 2 grid steps
    # whenever bn allows so the "parallel" axis shards across both
    # TensorCores on v7x (harmless single extra step on v5e/v6e).
    bn_eff = max(bn, 1)
    bn128 = _round_up(bn_eff, 128)
    if bn128 >= 256:
        tb = min(block_b, _round_up(pl.cdiv(bn128, 2), 128))
    else:
        tb = min(block_b, bn128)
    tb = max(128, _round_up(tb, 128))
    bn_pad = _round_up(bn128, tb)
    grid = (bn_pad // tb,)

    # (bn, 2) -> (2, bn_pad): batch on the lane dimension for both in & out.
    # Padded lanes hold zeros -> clamp/sin/cos produce harmless finite values
    # that are sliced off below.
    # TODO(synk): the (2, tb) input block still pads 2->8 sublanes (4x read
    # amplification); acceptable since the kernel is output-write bound.
    ang_t = jnp.transpose(angles.astype(jnp.float32))
    if bn_pad != bn:
        ang_t = jnp.pad(ang_t, ((0, 0), (0, bn_pad - bn)))

    kernel = functools.partial(
        _rotmat_kernel,
        az_min=az_min, az_max=az_max, ele_min=ele_min, ele_max=ele_max)

    out8 = pl.pallas_call(
        kernel,
        out_shape=jax.ShapeDtypeStruct((8, bn_pad), out_dtype),
        grid=grid,
        in_specs=[pl.BlockSpec((2, tb), lambda i: (0, i))],
        out_specs=pl.BlockSpec((8, tb), lambda i: (0, i)),
        compiler_params=pltpu.CompilerParams(
            dimension_semantics=("parallel",)),  # shards over 2 TCs on v7x
    )(ang_t)

    out8 = out8[:, :bn]
    if return_lane_major:
        return out8  # (8, bn) lane-dense slab, row order documented above.

    # Assemble (bn, 3, 4): insert the 4 structural zero entries and transpose
    # in one fused XLA pass.
    z1 = jnp.zeros((1, bn), out8.dtype)
    out12 = jnp.concatenate(
        [out8[0:3], z1, out8[3:6], z1, out8[6:7], z1, out8[7:8], z1], axis=0)
    return jnp.transpose(out12).reshape(bn, 3, 4)


def _reference(angles, az_min, az_max, ele_min, ele_max):
    """Pure-JAX replica of the PyTorch forward (explicit matrix composition)."""
    az = jnp.clip(angles[:, 0].astype(jnp.float32), az_min, az_max)
    ele = jnp.clip(angles[:, 1].astype(jnp.float32), ele_min, ele_max)
    sa, ca = jnp.sin(az), jnp.cos(az)
    se, ce = jnp.sin(ele), jnp.cos(ele)
    z = jnp.zeros_like(sa)
    o = jnp.ones_like(sa)
    r_az = jnp.stack([jnp.stack([ca, -sa, z], -1),
                      jnp.stack([sa, ca, z], -1),
                      jnp.stack([z, z, o], -1)], -2)
    r_ele = jnp.stack([jnp.stack([o, z, z], -1),
                       jnp.stack([z, ce, -se], -1),
                       jnp.stack([z, se, ce], -1)], -2)
    r0 = jnp.array([[0.0, 1.0, 0.0],
                    [-1.0, 0.0, 0.0],
                    [0.0, 0.0, 1.0]], jnp.float32)
    r = jnp.einsum("bij,bjk,kl->bil", r_az, r_ele, r0)
    zeros = jnp.zeros((angles.shape[0], 3, 1), r.dtype)
    return jnp.concatenate([r, zeros], axis=2)


if __name__ == "__main__":
    key = jax.random.PRNGKey(0)
    k1, k2 = jax.random.split(key)

    # Case 1: small batch, Pallas path forced (single grid step).
    bn = 8
    angles = jax.random.uniform(k1, (bn, 2), jnp.float32, minval=-2.0, maxval=2.0)
    out = jax.block_until_ready(get_rotation_matrix(angles, min_pallas_batch=0))
    ref = _reference(angles, AZ_MIN_DEFAULT, AZ_MAX_DEFAULT,
                     ELE_MIN_DEFAULT, ELE_MAX_DEFAULT)
    assert out.shape == (bn, 3, 4), out.shape
    if not bool(jnp.allclose(out, ref, atol=1e-5, rtol=1e-5)):
        raise AssertionError("Pallas kernel (bn=8) mismatches reference")

    # Case 2: non-multiple-of-128 batch with a tiny block -> multi-step grid
    # plus lane padding, Pallas path forced.
    bn2 = 300
    angles2 = jax.random.uniform(k2, (bn2, 2), jnp.float32, minval=-2.0, maxval=2.0)
    out2 = jax.block_until_ready(
        get_rotation_matrix(angles2, block_b=128, min_pallas_batch=0))
    ref2 = _reference(angles2, AZ_MIN_DEFAULT, AZ_MAX_DEFAULT,
                      ELE_MIN_DEFAULT, ELE_MAX_DEFAULT)
    assert out2.shape == (bn2, 3, 4), out2.shape
    if not bool(jnp.allclose(out2, ref2, atol=1e-5, rtol=1e-5)):
        raise AssertionError("Pallas kernel (bn=300, multi-step) mismatches reference")

    # Case 3: default small-batch fused-jnp fallback path.
    out3 = jax.block_until_ready(get_rotation_matrix(angles2))
    if not bool(jnp.allclose(out3, ref2, atol=1e-5, rtol=1e-5)):
        raise AssertionError("Fused small-batch path mismatches reference")

    print("KERNEL_OK")
</pallas_src>

<mosaic_0001>
module attributes {stable_mosaic.version = 11 : i64} {
  func.func @_rotmat_kernel(%arg0: i32, %arg1: memref<2x128xf32, #tpu.memory_space<vmem>>, %arg2: memref<8x128xf32, #tpu.memory_space<vmem>>) attributes {dimension_semantics = [#tpu.dimension_semantics<parallel>], iteration_bounds = array<i64: 1>, scalar_prefetch = 0 : i64, scratch_operands = 0 : i64, tpu.core_type = #tpu.core_type<tc>, window_params = [{transform_indices = @transform_0, window_bounds = array<i64: 2, 128>}, {transform_indices = @transform_1, window_bounds = array<i64: 8, 128>}]} {
    %c0 = arith.constant 0 : index
    %c0_0 = arith.constant 0 : index
    %0 = vector.load %arg1[%c0, %c0_0] : memref<2x128xf32, #tpu.memory_space<vmem>>, vector<1x128xf32>
    %cst = arith.constant -1.57079637 : f32
    %cst_1 = arith.constant 1.57079637 : f32
    %1 = vector.broadcast %cst : f32 to vector<1x128xf32>
    %2 = arith.maximumf %1, %0 : vector<1x128xf32>
    %3 = vector.broadcast %cst_1 : f32 to vector<1x128xf32>
    %4 = arith.minimumf %3, %2 : vector<1x128xf32>
    %c1 = arith.constant 1 : index
    %c0_2 = arith.constant 0 : index
    %5 = vector.load %arg1[%c1, %c0_2] : memref<2x128xf32, #tpu.memory_space<vmem>>, vector<1x128xf32>
    %cst_3 = arith.constant 0.000000e+00 : f32
    %cst_4 = arith.constant 0.69813168 : f32
    %6 = vector.broadcast %cst_3 : f32 to vector<1x128xf32>
    %7 = arith.maximumf %6, %5 : vector<1x128xf32>
    %8 = vector.broadcast %cst_4 : f32 to vector<1x128xf32>
    %9 = arith.minimumf %8, %7 : vector<1x128xf32>
    %10 = math.sin %4 : vector<1x128xf32>
    %11 = math.cos %4 : vector<1x128xf32>
    %12 = math.sin %9 : vector<1x128xf32>
    %13 = math.cos %9 : vector<1x128xf32>
    %14 = arith.mulf %10, %13 : vector<1x128xf32>
    %15 = arith.mulf %10, %12 : vector<1x128xf32>
    %16 = arith.mulf %11, %13 : vector<1x128xf32>
    %cst_5 = arith.constant 0.000000e+00 : f32
    %17 = vector.broadcast %cst_5 : f32 to vector<1x128xf32>
    %18 = arith.subf %17, %16 : vector<1x128xf32>
    %19 = arith.mulf %11, %12 : vector<1x128xf32>
    %cst_6 = arith.constant 0.000000e+00 : f32
    %20 = vector.broadcast %cst_6 : f32 to vector<1x128xf32>
    %21 = arith.subf %20, %19 : vector<1x128xf32>
    %cst_7 = arith.constant 0.000000e+00 : f32
    %22 = vector.broadcast %cst_7 : f32 to vector<1x128xf32>
    %23 = arith.subf %22, %12 : vector<1x128xf32>
    %24 = tpu.concatenate %14, %11, %15, %18, %10, %21, %23, %13 in 0 : vector<1x128xf32>, vector<1x128xf32>, vector<1x128xf32>, vector<1x128xf32>, vector<1x128xf32>, vector<1x128xf32>, vector<1x128xf32>, vector<1x128xf32> -> vector<8x128xf32>
    %c0_8 = arith.constant 0 : index
    %c0_9 = arith.constant 0 : index
    %25 = vector.load %arg2[%c0_8, %c0_9] : memref<8x128xf32, #tpu.memory_space<vmem>>, vector<8x128xf32>
    tpu.vector_store %arg2[%c0_8, %c0_9], %24 {strides = array<i32>} : memref<8x128xf32, #tpu.memory_space<vmem>>, vector<8x128xf32>,
    return
  }
  func.func @transform_0(%arg0: i32) -> (i32, i32) {
    %c0_i32 = arith.constant 0 : i32
    %c0_i32_0 = arith.constant 0 : i32
    return %c0_i32, %arg0 : i32, i32
  }
  func.func @transform_1(%arg0: i32) -> (i32, i32) {
    %c0_i32 = arith.constant 0 : i32
    %c0_i32_0 = arith.constant 0 : i32
    return %c0_i32, %arg0 : i32, i32
  }
}

</mosaic_0001>

<bundles_post_ra>
// kernel: tpu_custom_call.1
= control target key start
LH: loop header
LB: loop body
LE: loop exit
PB: predicated region body
PF: predicated region fallthrough
CT: control target
= control target key end

     0   :  { %6 = vsyncpa [#allocation3], 0  ;;  %s946_s0 = inlined_call_operand.hbm [shape: f32[2,128], index: 0, kind: input, shape index: {}]   ;;  %s947_s1 = inlined_call_operand.hbm [shape: f32[8,128], index: 1, kind: output, shape index: {}]  }
   0x1   :  { %7 = vsyncpa [#allocation4], 0  ;;  %s13_s8 = sshll.u32 %s946_s0, 4  ;;  %s781_s9 = smov [#allocation2]   ;;  %s14_s8 = int_to_ptr.hbm [resolvable:$true] %s13_s8 }
   0x2   :  { %s15_s10 = sshll.u32 %s781_s9, 4  ;;  %s16_s10 = int_to_ptr.vmem [resolvable:$true] %s15_s10 }
   0x3   :  { %18 = dma.hbm_to_vmem [thread:$0]  %s14_s8, 32, %s16_s10, [#allocation3]  }
   0x4   :  { %777 = dma.done.wait [#allocation3], 32  }
   0x5   :  { %778 = vsyncadd [#allocation3], 4294967264  ;;  %v23_v0 = vld [vmem:[#allocation2] sm:$0x1]  ;;  %v26_v1 = vld [vmem:[#allocation2 + $0x1] sm:$0x1] }
   0x6   :  { %v803_v2 = vclamps-f32 %v23_v0, 1.5707964  ;;  %v27_v3 = vmax.f32 %v26_v1, 0.0  ;;  %v782_v24 = vmov 683565275   ;;  %s789_s0 = smov [#allocation5]  }
   0x7   :  { %v783_v26 = vmov 2475754826   ;;  %v784_v28 = vmov 2131351028   ;;  %v785_v30 = vmov 2102212464  }
   0x8   :  { %v805_v4 = vmin.f32 %v27_v3, 0.6981317  ;;  %v29_v5 = vand.u32 2147483647, %v803_v2  ;;  %v32_v6 = vand.u32 2139095040, %v803_v2  ;;  %s695_s11 = sshll.u32 %s789_s0, 4  ;;  %s696_s11 = int_to_ptr.vmem [resolvable:$true] %s695_s11 }
   0x9   :  { %v786_v32 = vmov 920167782   ;;  %v787_v41 = vmov 1326507024   ;;  %s697_s14 = sshll.u32 %s947_s1, 4  ;;  %s698_s14 = int_to_ptr.hbm [resolvable:$true] %s697_s14 }
   0xa   :  { %v33_v7 = vshrl.u32 %v32_v6, 23  ;;  %v36_v8 = vand.u32 8388607, %v29_v5  ;;  %v341_v9 = vand.u32 2139095040, %v805_v4  ;;  %v338_v10 = vand.u32 2147483647, %v805_v4 }
   0xc   :  { %v708_v11 = vadd.s32 4294967169, %v33_v7  ;;  %v342_v12 = vshrl.u32 %v341_v9, 23  ;;  %v37_v13 = vor.u32 8388608, %v36_v8  ;;  %v345_v16 = vand.u32 8388607, %v338_v10 }
   0xe   :  { %v39_v14 = vadd.s32 1, %v708_v11  ;;  %v714_v15 = vadd.s32 4294967169, %v342_v12  ;;  %v815_v19 = vshll.u32 %v37_v13, 8  ;;  %v346_v22 = vor.u32 8388608, %v345_v16 }
  0x10   :  { %vm40_vm0 = vcmp.gt.s32.totalorder %v39_v14, 0  ;;  %v348_v17 = vadd.s32 1, %v714_v15  ;;  %v78_v34 = vand.u32 65535, %v815_v19  ;;  %v79_v59 = vshrl.u32 %v815_v19, 16 }
  0x11   :  { %v41_v18 = vsel %vm40_vm0, %v39_v14, 0  ;;  %v831_v60 = vshll.u32 %v346_v22, 8 }
  0x12   :  { %v43_v20 = vand.u32 31, %v41_v18  ;;  %vm349_vm1 = vcmp.gt.s32.totalorder %v348_v17, 0  ;;  %v42_v21 = vshrl.u32 %v41_v18, 5 }
  0x13   :  { %v350_v35 = vsel %vm349_vm1, %v348_v17, 0 }
  0x14   :  { %v44_v23 = vsub.s32 32, %v43_v20  ;;  %v46_v25 = vshll.u32 %v782_v24, %v43_v20  ;;  %v49_v27 = vshll.u32 %v783_v26, %v43_v20  ;;  %v52_v29 = vshll.u32 %v784_v28, %v43_v20 }
  0x15   :  { %v55_v31 = vshll.u32 %v785_v30, %v43_v20  ;;  %v58_v33 = vshll.u32 %v786_v32, %v43_v20  ;;  %vm61_vm2 = vcmp.lt.s32.totalorder %v42_v21, 1  ;;  %vm62_vm3 = vcmp.lt.s32.totalorder %v42_v21, 2 }
  0x16   :  { %v45_v36 = vshrl.u32 %v782_v24, %v44_v23  ;;  %v47_v37 = vshrl.u32 %v783_v26, %v44_v23  ;;  %v50_v38 = vshrl.u32 %v784_v28, %v44_v23  ;;  %v53_v39 = vshrl.u32 %v785_v30, %v44_v23 }
  0x17   :  { %v56_v40 = vshrl.u32 %v786_v32, %v44_v23  ;;  %v59_v42 = vshrl.u32 %v787_v41, %v44_v23  ;;  %vm64_vm4 = vcmp.lt.s32.totalorder %v42_v21, 4  ;;  %vm63_vm5 = vcmp.lt.s32.totalorder %v42_v21, 3 }
  0x18   :  { %v48_v43 = vor.u32 %v47_v37, %v46_v25  ;;  %v51_v44 = vor.u32 %v50_v38, %v49_v27  ;;  %v54_v45 = vor.u32 %v53_v39, %v52_v29  ;;  %v825_v48 = vand.u32 31, %v350_v35 }
  0x19   :  { %v57_v46 = vor.u32 %v56_v40, %v55_v31  ;;  %v60_v47 = vor.u32 %v59_v42, %v58_v33  ;;  %v838_v0 = vshrl.u32 %v350_v35, 5  ;;  %v788_v38 = vmov 0  }
  0x1a   :  { %v65_v49 = vsel %vm61_vm2, %v45_v36, %v48_v43  ;;  %v66_v50 = vsel %vm64_vm4, %v54_v45, 2102212464  ;;  %v69_v51 = vsel %vm61_vm2, %v48_v43, %v51_v44  ;;  %v73_v52 = vsel %vm61_vm2, %v51_v44, %v54_v45 }
  0x1b   :  { %v67_v53 = vsel %vm63_vm5, %v51_v44, %v66_v50  ;;  %v70_v54 = vsel %vm64_vm4, %v57_v46, 920167782  ;;  %v74_v55 = vsel %vm64_vm4, %v60_v47, 1326507024  ;;  %v828_v56 = vsub.s32 32, %v825_v48 }
  0x1c   :  { %v71_v57 = vsel %vm63_vm5, %v54_v45, %v70_v54  ;;  %v75_v58 = vsel %vm63_vm5, %v57_v46, %v74_v55  ;;  %v834_v61 = vsel %vm62_vm3, %v65_v49, %v67_v53  ;;  %v355_v8 = vshll.u32 %v782_v24, %v825_v48 }
  0x1d   :  { %v72_v62 = vsel %vm62_vm3, %v69_v51, %v71_v57  ;;  %v76_v63 = vsel %vm62_vm3, %v73_v52, %v75_v58  ;;  %v356_v9 = vshrl.u32 %v783_v26, %v828_v56  ;;  %v358_v11 = vshll.u32 %v783_v26, %v825_v48 }
  0x1e   :  { %v80_v1 = vand.u32 65535, %v76_v63  ;;  %v81_v3 = vshrl.u32 %v76_v63, 16  ;;  %v102_v6 = vand.u32 65535, %v72_v62  ;;  %v103_v7 = vshrl.u32 %v72_v62, 16 }
  0x1f   :  { %v359_v12 = vshrl.u32 %v784_v28, %v828_v56  ;;  %v361_v16 = vshll.u32 %v784_v28, %v825_v48  ;;  %v846_v37 = vor.u32 %v356_v9, %v355_v8  ;;  %v364_v43 = vshll.u32 %v785_v30, %v825_v48 }
  0x20   :  { %v82_v13 = vmul.u32 %v80_v1, %v78_v34  ;;  %v83_v14 = vmul.u32 %v81_v3, %v78_v34  ;;  %v84_v15 = vmul.u32 %v80_v1, %v79_v59  ;;  %v85_v17 = vmul.u32 %v81_v3, %v79_v59 }
  0x21   :  { %v104_v18 = vmul.u32 %v102_v6, %v78_v34  ;;  %v105_v20 = vmul.u32 %v103_v7, %v78_v34  ;;  %v106_v21 = vmul.u32 %v102_v6, %v79_v59  ;;  %v107_v27 = vmul.u32 %v103_v7, %v79_v59 }
  0x22   :  { %v86_v22 = vshll.u32 %v83_v14, 16  ;;  %v87_v23 = vshrl.u32 %v83_v14, 16  ;;  %v88_v25 = vshll.u32 %v84_v15, 16  ;;  %v89_v29 = vshrl.u32 %v84_v15, 16 }
  0x23   :  { %v108_v31 = vshll.u32 %v105_v20, 16  ;;  %v109_v33 = vshrl.u32 %v105_v20, 16  ;;  %v110_v35 = vshll.u32 %v106_v21, 16  ;;  %v111_v36 = vshrl.u32 %v106_v21, 16 }
  0x24   :  { %vm90_vm6 = vc.u32 %v82_v13, %v86_v22  ;;  %v92_v26 = vadd.s32 %v86_v22, %v82_v13  ;;  %v362_v34 = vshrl.u32 %v785_v30, %v828_v56  ;;  %v855_v46 = vor.u32 %v359_v12, %v358_v11 }
  0x25   :  { %v91_v28 = vsel %vm90_vm6, 1, %v788_v38  ;;  %vm112_vm7 = vc.u32 %v104_v18, %v108_v31  ;;  %v114_v39 = vadd.s32 %v108_v31, %v104_v18  ;;  %v365_v51 = vshrl.u32 %v786_v32, %v828_v56 }
  0x26   :  { %v93_v40 = vadd.s32 %v91_v28, %v85_v17  ;;  %vm94_vm8 = vc.u32 %v92_v26, %v88_v25  ;;  %v113_v42 = vsel %vm112_vm7, 1, %v788_v38  ;;  %v363_v50 = vor.u32 %v362_v34, %v361_v16 }
  0x27   :  { %v95_v44 = vsel %vm94_vm8, 1, %v788_v38  ;;  %v115_v45 = vadd.s32 %v113_v42, %v107_v27  ;;  %vm116_vm9 = vc.u32 %v114_v39, %v110_v35  ;;  %v367_v53 = vshll.u32 %v786_v32, %v825_v48 }
  0x28   :  { %v97_v47 = vadd.s32 %v95_v44, %v93_v40  ;;  %v117_v49 = vsel %vm116_vm9, 1, %v788_v38  ;;  %v368_v30 = vshrl.u32 %v787_v41, %v828_v56  ;;  %vm370_vm10 = vcmp.lt.s32.totalorder %v838_v0, 1 }
  0x29   :  { %v119_v52 = vadd.s32 %v117_v49, %v115_v45  ;;  %v865_v55 = vadd.s32 %v114_v39, %v110_v35  ;;  %v366_v57 = vor.u32 %v365_v51, %v364_v43  ;;  %vm372_vm11 = vcmp.lt.s32.totalorder %v838_v0, 3 }
  0x2a   :  { %v98_v54 = vadd.s32 %v97_v47, %v87_v23  ;;  %v369_v59 = vor.u32 %v368_v30, %v367_v53  ;;  %vm371_vm12 = vcmp.lt.s32.totalorder %v838_v0, 2  ;;  %vm373_vm13 = vcmp.lt.s32.totalorder %v838_v0, 4 }
  0x2b   :  { %v120_v58 = vadd.s32 %v119_v52, %v109_v33  ;;  %v378_v32 = vsel %vm370_vm10, %v846_v37, %v855_v46  ;;  %v379_v41 = vsel %vm373_vm13, %v366_v57, 920167782  ;;  %v387_v1 = vand.u32 65535, %v831_v60 }
  0x2c   :  { %v870_v62 = vadd.s32 %v98_v54, %v89_v29  ;;  %v380_v63 = vsel %vm372_vm11, %v363_v50, %v379_v41  ;;  %v388_v3 = vshrl.u32 %v831_v60, 16  ;;  %v122_v6 = vmul.u32 %v815_v19, %v834_v61 }
  0x2d   :  { %v121_v48 = vadd.s32 %v120_v58, %v111_v36  ;;  %v381_v7 = vsel %vm371_vm12, %v378_v32, %v380_v63  ;;  %v382_v8 = vsel %vm370_vm10, %v855_v46, %v363_v50  ;;  %v383_v11 = vsel %vm373_vm13, %v369_v59, 1326507024 }
  0x2e   :  { %vm124_vm14 = vc.u32 %v870_v62, %v865_v55  ;;  %v411_v12 = vand.u32 65535, %v381_v7  ;;  %v412_v13 = vshrl.u32 %v381_v7, 16  ;;  %v384_v14 = vsel %vm372_vm11, %v366_v57, %v383_v11 }
  0x2f   :  { %v125_v9 = vadd.s32 1, %v121_v48  ;;  %v385_v61 = vsel %vm371_vm12, %v382_v8, %v384_v14  ;;  %v354_v40 = vshrl.u32 %v782_v24, %v828_v56  ;;  %v375_v43 = vsel %vm373_vm13, %v363_v50, 2102212464 }
  0x30   :  { %v414_v15 = vmul.u32 %v412_v13, %v387_v1  ;;  %v389_v17 = vand.u32 65535, %v385_v61  ;;  %v390_v18 = vshrl.u32 %v385_v61, 16  ;;  %v413_v20 = vmul.u32 %v411_v12, %v387_v1 }
  0x31   :  { %v126_v19 = vsel %vm124_vm14, %v125_v9, %v121_v48  ;;  %v415_v21 = vmul.u32 %v411_v12, %v388_v3  ;;  %v416_v28 = vmul.u32 %v412_v13, %v388_v3  ;;  %v374_v32 = vsel %vm370_vm10, %v354_v40, %v846_v37 }
  0x32   :  { %v127_v16 = vadd.s32 %v126_v19, %v122_v6  ;;  %v417_v22 = vshll.u32 %v414_v15, 16  ;;  %v391_v25 = vmul.u32 %v389_v17, %v387_v1  ;;  %v392_v27 = vmul.u32 %v390_v18, %v387_v1 }
  0x33   :  { %v393_v29 = vmul.u32 %v389_v17, %v388_v3  ;;  %v419_v31 = vshll.u32 %v415_v21, 16  ;;  %v394_v35 = vmul.u32 %v390_v18, %v388_v3  ;;  %v418_v53 = vshrl.u32 %v414_v15, 16 }
  0x34   :  { %v128_v23 = vadd.s32 536870912, %v127_v16  ;;  %v395_v26 = vshll.u32 %v392_v27, 16  ;;  %vm421_vm15 = vc.u32 %v413_v20, %v417_v22  ;;  %v423_v39 = vadd.s32 %v417_v22, %v413_v20 }
  0x35   :  { %v397_v36 = vshll.u32 %v393_v29, 16  ;;  %v422_v45 = vsel %vm421_vm15, 1, %v788_v38  ;;  %v396_v49 = vshrl.u32 %v392_v27, 16  ;;  %v398_v54 = vshrl.u32 %v393_v29, 16 }
  0x36   :  { %v897_v33 = vshrl.u32 %v128_v23, 30  ;;  %vm399_vm0 = vc.u32 %v391_v25, %v395_v26  ;;  %v401_v42 = vadd.s32 %v395_v26, %v391_v25  ;;  %vm425_vm1 = vc.u32 %v423_v39, %v419_v31 }
  0x37   :  { %v400_v44 = vsel %vm399_vm0, 1, %v788_v38  ;;  %v424_v30 = vadd.s32 %v422_v45, %v416_v28  ;;  %v426_v24 = vsel %vm425_vm1, 1, %v788_v38  ;;  %v420_v50 = vshrl.u32 %v415_v21, 16 }
  0x38   :  { %v130_v34 = vshll.u32 %v897_v33, 30  ;;  %v402_v51 = vadd.s32 %v400_v44, %v394_v35  ;;  %vm403_vm2 = vc.u32 %v401_v42, %v397_v36  ;;  %v376_v41 = vsel %vm372_vm11, %v855_v46, %v375_v43 }
  0x39   :  { %v404_v52 = vsel %vm403_vm2, 1, %v788_v38  ;;  %v428_v58 = vadd.s32 %v426_v24, %v424_v30  ;;  %v427_v1 = vadd.s32 %v423_v39, %v419_v31  ;;  %v377_v7 = vsel %vm371_vm12, %v374_v32, %v376_v41 }
  0x3a   :  { %v131_v47 = vsub.s32 %v127_v16, %v130_v34  ;;  %v406_v57 = vadd.s32 %v404_v52, %v402_v51  ;;  %v123_v9 = vadd.s32 %v865_v55, %v870_v62  ;;  %v431_v12 = vmul.u32 %v831_v60, %v377_v7 }
  0x3b   :  { %v429_v3 = vadd.s32 %v428_v58, %v418_v53  ;;  %vm31_vm6 = vcmp.lt.s32.totalorder %v803_v2, 0  ;;  %vm922_vm7 = vcmp.le.f32.partialorder %v29_v5, 0.7853982  ;;  %vm340_vm10 = vcmp.lt.s32.totalorder %v805_v4, 0 }
  0x3c   :  { %vm132_vm3 = vcmp.lt.s32.totalorder %v131_v47, 0  ;;  %v133_v56 = vsub.s32 0, %v131_v47  ;;  %v407_v48 = vadd.s32 %v406_v57, %v396_v49  ;;  %vm339_vm11 = vcmp.le.f32.partialorder %v338_v10, 0.7853982 }
  0x3d   :  { %v430_v8 = vadd.s32 %v429_v3, %v420_v50 }
  0x3e   :  { %v134_v59 = vsel %vm132_vm3, %v133_v56, %v131_v47  ;;  %v408_v38 = vadd.s32 %v407_v48, %v398_v54  ;;  %v153_v56 = vsub.s32 4, %v897_v33 }
  0x3f   :  { %v135_v63 = vclz %v134_v59  ;;  %v434_v37 = vadd.s32 1, %v430_v8 }
  0x40   :  { %vm433_vm5 = vc.u32 %v408_v38, %v427_v1  ;;  %v432_v40 = vadd.s32 %v427_v1, %v408_v38  ;;  %v154_v32 = vsel %vm31_vm6, %v153_v56, %v897_v33 }
  0x41   :  { %v709_v6 = vadd.s32 4294967294, %v135_v63  ;;  %v435_v19 = vsel %vm433_vm5, %v434_v37, %v430_v8  ;;  %v156_v38 = vsel %vm922_vm7, 0, %v154_v32 }
  0x42   :  { %v436_v16 = vadd.s32 %v435_v19, %v431_v12  ;;  %v173_v33 = vadd.s32 3, %v156_v38  ;;  %v328_v19 = vand.u32 3, %v156_v38 }
  0x43   :  { %vm710_vm4 = vcmp.lt.s32.totalorder %v709_v6, 0 }
  0x44   :  { %v138_v11 = vsel %vm710_vm4, 0, %v709_v6  ;;  %v437_v18 = vadd.s32 536870912, %v436_v16  ;;  %vm333_vm12 = vcmp.eq.s32.totalorder %v328_v19, 2  ;;  %vm330_vm15 = vcmp.eq.s32.totalorder %v328_v19, 0 }
  0x45   :  { %v139_v46 = vsub.s32 32, %v138_v11  ;;  %v140_v13 = vshll.u32 %v131_v47, %v138_v11  ;;  %v143_v14 = vsub.s32 4294967266, %v138_v11  ;;  %vm329_vm1 = vcmp.lt.s32.totalorder %v328_v19, 2 }
  0x46   :  { %v438_v22 = vshrl.u32 %v437_v18, 30  ;;  %vm172_vm4 = vweird.f32 %v803_v2 }
  0x47   :  { %v141_v61 = vshrl.u32 %v123_v9, %v139_v46  ;;  %v144_v15 = vadd.s32 127, %v143_v14 }
  0x48   :  { %v439_v62 = vshll.u32 %v438_v22, 30  ;;  %v462_v63 = vsub.s32 4, %v438_v22 }
  0x49   :  { %v142_v17 = vor.u32 %v141_v61, %v140_v13  ;;  %v145_v0 = vshll.u32 %v144_v15, 23  ;;  %v174_v15 = vand.u32 3, %v173_v33 }
  0x4a   :  { %v440_v25 = vsub.s32 %v436_v16, %v439_v62  ;;  %v463_v8 = vsel %vm340_vm10, %v462_v63, %v438_v22 }
  0x4b   :  { %v146_v20 = vor.u32 4788187, %v145_v0  ;;  %v149_v21 = vcvt.s32.f32 %v142_v17  ;;  %v465_v12 = vsel %vm339_vm11, 0, %v463_v8  ;;  %vm179_vm13 = vcmp.eq.s32.totalorder %v174_v15, 2 }
  0x4c   :  { %vm441_vm8 = vcmp.lt.s32.totalorder %v440_v25, 0  ;;  %v442_v29 = vsub.s32 0, %v440_v25  ;;  %v482_v17 = vadd.s32 3, %v465_v12  ;;  %vm176_vm14 = vcmp.eq.s32.totalorder %v174_v15, 0 }
  0x4d   :  { %v147_v55 = vand.u32 2147483647, %v146_v20  ;;  %vm175_vm0 = vcmp.lt.s32.totalorder %v174_v15, 2 }
  0x4e   :  { %v443_v26 = vsel %vm441_vm8, %v442_v29, %v440_v25  ;;  %v483_v62 = vand.u32 3, %v482_v17 }
  0x4f   :  { %v150_v23 = vmul.f32 %v149_v21, %v147_v55  ;;  %v444_v28 = vclz %v443_v26 }
  0x50   :  { %vm488_vm2 = vcmp.eq.s32.totalorder %v483_v62, 2  ;;  %vm484_vm5 = vcmp.lt.s32.totalorder %v483_v62, 2 }
  0x51   :  { %v151_v27 = vxor.u32 2147483648, %v150_v23  ;;  %v715_v39 = vadd.s32 4294967294, %v444_v28 }
  0x53   :  { %v152_v31 = vsel %vm31_vm6, %v151_v27, %v150_v23  ;;  %vm716_vm9 = vcmp.lt.s32.totalorder %v715_v39, 0  ;;  %v637_v23 = vand.u32 3, %v465_v12  ;;  %vm485_vm6 = vcmp.eq.s32.totalorder %v483_v62, 0 }
  0x54   :  { %v155_v35 = vsel %vm922_vm7, %v803_v2, %v152_v31  ;;  %v447_v5 = vsel %vm716_vm9, 0, %v715_v39  ;;  %vm481_vm9 = vweird.f32 %v805_v4 }
  0x55   :  { %v157_v36 = vmul.f32 %v155_v35, %v155_v35  ;;  %v448_v43 = vsub.s32 32, %v447_v5  ;;  %v449_v44 = vshll.u32 %v440_v25, %v447_v5  ;;  %v452_v47 = vsub.s32 4294967266, %v447_v5 }
  0x56   :  { %vm642_vm3 = vcmp.eq.s32.totalorder %v637_v23, 2  ;;  %vm639_vm7 = vcmp.eq.s32.totalorder %v637_v23, 0  ;;  %vm638_vm8 = vcmp.lt.s32.totalorder %v637_v23, 2 }
  0x57   :  { %v165_v34 = vmul.f32 -0.00019511016, %v157_v36  ;;  %v158_v42 = vmul.f32 -0.001358992, %v157_v36  ;;  %v450_v49 = vshrl.u32 %v432_v40, %v448_v43  ;;  %v453_v51 = vadd.s32 127, %v452_v47 }
  0x59   :  { %v166_v45 = vadd.f32 0.008332121, %v165_v34  ;;  %v159_v52 = vadd.f32 0.041655596, %v158_v42  ;;  %v451_v53 = vor.u32 %v450_v49, %v449_v44  ;;  %v454_v24 = vshll.u32 %v453_v51, 23 }
  0x5b   :  { %v167_v30 = vmul.f32 %v166_v45, %v157_v36  ;;  %v455_v54 = vor.u32 4788187, %v454_v24  ;;  %v458_v57 = vcvt.s32.f32 %v451_v53  ;;  %v160_v50 = vmul.f32 %v159_v52, %v157_v36 }
  0x5d   :  { %v168_v58 = vadd.f32 -0.16666654, %v167_v30  ;;  %v456_v59 = vand.u32 2147483647, %v455_v54  ;;  %v161_v48 = vadd.f32 -0.4999988, %v160_v50 }
  0x5f   :  { %v459_v41 = vmul.f32 %v458_v57, %v456_v59  ;;  %v169_v1 = vmul.f32 %v168_v58, %v157_v36  ;;  %v162_v7 = vmul.f32 %v161_v48, %v157_v36 }
  0x61   :  { %v460_v3 = vxor.u32 2147483648, %v459_v41  ;;  %v170_v37 = vadd.f32 1.0, %v169_v1  ;;  %v163_v14 = vadd.f32 1.0, %v162_v7 }
  0x63   :  { %v461_v6 = vsel %vm340_vm10, %v460_v3, %v459_v41  ;;  %v171_v61 = vmul.f32 %v170_v37, %v155_v35  ;;  %v180_v20 = vxor.u32 2147483648, %v163_v14  ;;  %vm675_vm10 = vcmask 1040384  }
  0x64   :  { %v464_v9 = vsel %vm339_vm11, %v805_v4, %v461_v6  ;;  %vm677_vm11 = vcmask 1041408  }
  0x65   :  { %v466_v11 = vmul.f32 %v464_v9, %v464_v9  ;;  %v177_v21 = vxor.u32 2147483648, %v171_v61  ;;  %v181_v27 = vsel %vm179_vm13, %v180_v20, %v171_v61  ;;  %v335_v29 = vsel %vm333_vm12, %v180_v20, %v171_v61 }
  0x66   :  { %vm679_vm12 = vcmask 1042432   ;;  %vm681_vm13 = vcmask 1043456  }
  0x67   :  { %v467_v46 = vmul.f32 -0.001358992, %v466_v11  ;;  %v474_v13 = vmul.f32 -0.00019511016, %v466_v11  ;;  %v178_v31 = vsel %vm176_vm14, %v163_v14, %v177_v21  ;;  %v332_v35 = vsel %vm330_vm15, %v163_v14, %v177_v21 }
  0x68   :  { %v182_v34 = vsel %vm175_vm0, %v178_v31, %v181_v27  ;;  %v336_v40 = vsel %vm329_vm1, %v332_v35, %v335_v29  ;;  %vm683_vm14 = vcmask 1044480   ;;  %vm685_vm15 = vcmask 1045504  }
  0x69   :  { %v468_v10 = vadd.f32 0.041655596, %v467_v46  ;;  %v475_v16 = vadd.f32 0.008332121, %v474_v13  ;;  %v183_v44 = vsel %vm172_vm4, nan, %v182_v34  ;;  %v337_v45 = vsel %vm172_vm4, nan, %v336_v40 }
  0x6a   :  { %v655_v2 = vrot.slane %v337_v45, 7  ;;  %v664_v41 = vrot.slane %v183_v44, 4  ;;  %vm687_vm0 = vcmask 1046528  }
  0x6b   :  { %v469_v0 = vmul.f32 %v468_v10, %v466_v11  ;;  %v476_v18 = vmul.f32 %v475_v16, %v466_v11 }
  0x6d   :  { %v470_v22 = vadd.f32 -0.4999988, %v469_v0  ;;  %v477_v55 = vadd.f32 -0.16666654, %v476_v18 }
  0x6f   :  { %v471_v25 = vmul.f32 %v470_v22, %v466_v11  ;;  %v478_v60 = vmul.f32 %v477_v55, %v466_v11 }
  0x71   :  { %v472_v26 = vadd.f32 1.0, %v471_v25  ;;  %v479_v36 = vadd.f32 1.0, %v478_v60 }
  0x73   :  { %v480_v28 = vmul.f32 %v479_v36, %v464_v9  ;;  %v489_v39 = vxor.u32 2147483648, %v472_v26 }
  0x75   :  { %v486_v5 = vxor.u32 2147483648, %v480_v28  ;;  %v490_v42 = vsel %vm488_vm2, %v489_v39, %v480_v28  ;;  %v644_v43 = vsel %vm642_vm3, %v489_v39, %v480_v28 }
  0x77   :  { %v487_v47 = vsel %vm485_vm6, %v472_v26, %v486_v5  ;;  %v641_v49 = vsel %vm639_vm7, %v472_v26, %v486_v5 }
  0x78   :  { %v491_v51 = vsel %vm484_vm5, %v487_v47, %v490_v42  ;;  %v645_v52 = vsel %vm638_vm8, %v641_v49, %v644_v43 }
  0x79   :  { %v492_v53 = vsel %vm481_vm9, nan, %v491_v51  ;;  %v646_v30 = vsel %vm481_vm9, nan, %v645_v52 }
  0x7a   :  { %v647_v24 = vmul.f32 %v646_v30, %v183_v44  ;;  %v648_v56 = vmul.f32 %v492_v53, %v183_v44  ;;  %v649_v54 = vmul.f32 %v646_v30, %v337_v45  ;;  %v651_v57 = vmul.f32 %v492_v53, %v337_v45 }
  0x7b   :  { %v653_v50 = vsub.f32 0.0, %v492_v53  ;;  %v673_v38 = vrot.slane %v646_v30, 1 }
  0x7c   :  { %v650_v58 = vsub.f32 0.0, %v649_v54  ;;  %v652_v59 = vsub.f32 0.0, %v651_v57  ;;  %v658_v32 = vrot.slane %v648_v56, 6  ;;  %v676_v4 = vsel %vm675_vm10, %v647_v24, %v655_v2 }
  0x7d   :  { %v670_v3 = vrot.slane %v653_v50, 2 }
  0x7e   :  { %v661_v48 = vrot.slane %v650_v58, 5  ;;  %v667_v63 = vrot.slane %v652_v59, 3  ;;  %v678_v1 = vsel %vm677_vm11, %v676_v4, %v658_v32 }
  0x80   :  { %v680_v6 = vsel %vm679_vm12, %v678_v1, %v661_v48 }
  0x81   :  { %v682_v7 = vsel %vm681_vm13, %v680_v6, %v664_v41 }
  0x82   :  { %v684_v8 = vsel %vm683_vm14, %v682_v7, %v667_v63 }
  0x83   :  { %v686_v9 = vsel %vm685_vm15, %v684_v8, %v670_v3 }
  0x84   :  { %v688_v37 = vsel %vm687_vm0, %v686_v9, %v673_v38 }
  0x85   :  { %689 = vst [vmem:[#allocation5] sm:$0xff] %v688_v37 }
  0x86   :  { %700 = dma.vmem_to_hbm [thread:$0]  %s696_s11, 128, %s698_s14, [#allocation4]  }
  0x87   :  { %779 = dma.done.wait [#allocation4], 128  }
  0x88   :  { %780 = vsyncadd [#allocation4], 4294967168 }
  0x89   :  { %705 = vsyncpa [#allocation3], 1 }
  0x8a   :  { %706 = vsyncpa [#allocation4], 1 }

</bundles_post_ra>
